<compile_context>
chip_gen: v7x
topology: tpu7x:2x2x1
jax: 0.10.0
libtpu: 0.0.40
codegen_flags: <defaults>
</compile_context>

<pallas_src>
import functools

import jax
import jax.numpy as jnp
from jax.experimental import pallas as pl
from jax.experimental.pallas import tpu as pltpu

_SUBLANE = 8    # f32 sublane multiple
_LANE = 128     # lane width


# ---------------------------------------------------------------------------
# Kernels
# ---------------------------------------------------------------------------
def _simple_kernel(x_ref, w1_ref, b1_ref, w2_ref, b2_ref, o_ref):
    """Both full DxD weights resident in VMEM; grid is batch tiles only."""
    x = x_ref[...]                                             # f32 (block_b, D)
    h = jnp.dot(x.astype(jnp.bfloat16), w1_ref[...],
                preferred_element_type=jnp.float32)            # MXU bf16 -> f32
    h = jnp.maximum(h + b1_ref[...], 0.0)                      # VPU f32
    out = jnp.dot(h.astype(jnp.bfloat16), w2_ref[...],
                  preferred_element_type=jnp.float32)
    o_ref[...] = jnp.maximum(out + b2_ref[...] + x, 0.0).astype(o_ref.dtype)


def _hidden_tiled_kernel(x_ref, w1_ref, b1_ref, w2_ref, b2_ref, o_ref, acc_ref):
    """Hidden dim tiled: grid = (batch tiles, hidden tiles); accumulate linear2."""
    h_idx = pl.program_id(1)

    @pl.when(h_idx == 0)
    def _():
        acc_ref[...] = jnp.zeros_like(acc_ref)

    x = x_ref[...]                                             # resident across h axis
    h = jnp.dot(x.astype(jnp.bfloat16), w1_ref[...],
                preferred_element_type=jnp.float32)            # (block_b, block_h)
    h = jnp.maximum(h + b1_ref[...], 0.0)
    acc_ref[...] += jnp.dot(h.astype(jnp.bfloat16), w2_ref[...],
                            preferred_element_type=jnp.float32)

    @pl.when(h_idx == pl.num_programs(1) - 1)
    def _():
        o_ref[...] = jnp.maximum(acc_ref[...] + b2_ref[...] + x, 0.0).astype(o_ref.dtype)


# ---------------------------------------------------------------------------
# Tiling heuristics
# ---------------------------------------------------------------------------
def _round_up(x, m):
    return ((x + m - 1) // m) * m


def _vmem_budget_bytes():
    """~80% of per-core VMEM: ~51 MiB (v7x), ~102 MiB (v5e/v6e)."""
    try:
        phys = int(pltpu.get_tpu_info().vmem_capacity_bytes)
    except Exception:
        phys = 64 * 1024 * 1024   # conservative fallback (v7x-sized)
    return (phys * 4) // 5


def _choose_tiles(B, D, budget):
    """Pick (block_b, block_h) against the VMEM budget."""
    # --- hidden (weight) tiling -------------------------------------------
    w_resident = 2 * D * D * 2            # two DxD bf16 matrices, single-buffered
    weight_budget = (budget * 3) // 5     # leave >= 40% for activations
    if w_resident <= weight_budget or D % _LANE != 0:
        block_h = D                        # weights fully resident (common case)
        w_bytes = w_resident
    else:
        # per grid step: (D, th) + (th, D) bf16, double-buffered -> 8*D*th bytes.
        max_th = weight_budget // (8 * D)
        block_h = max(_LANE, (max_th // _LANE) * _LANE)
        while block_h > _LANE and D % block_h != 0:   # th must divide D exactly
            block_h -= _LANE
        w_bytes = 8 * D * block_h

    # --- batch tiling from the remaining activation budget ----------------
    per_row = 16 * D + (4 * D if block_h < D else 0)  # x(2buf)+out(2buf) f32 (+acc)
    act_budget = max(budget - w_bytes - (2 << 20), per_row * _SUBLANE)
    max_rows = int(min(1024, max(_SUBLANE, act_budget // per_row)))

    if B <= max_rows:
        block_b = _round_up(B, _SUBLANE)          # single tile, no forced split
    elif max_rows >= 256:
        block_b = (max_rows // 256) * 256          # MXU-aligned M for big batches
    else:
        block_b = (max_rows // _SUBLANE) * _SUBLANE
    return int(block_b), int(block_h)


# ---------------------------------------------------------------------------
# pallas_call wrappers
# ---------------------------------------------------------------------------
@functools.partial(jax.jit,
                   static_argnames=("block_b", "block_h", "vmem_limit_bytes"))
def _residual_block_call(x, w1_t, b1, w2_t, b2, *, block_b, block_h,
                         vmem_limit_bytes):
    B, D = x.shape
    grid_b = pl.cdiv(B, block_b)

    # No-op if weights are already bf16 (cast once outside, per review).
    w1_bf = w1_t.astype(jnp.bfloat16)
    w2_bf = w2_t.astype(jnp.bfloat16)
    b1_f = b1.reshape(1, D).astype(jnp.float32)
    b2_f = b2.reshape(1, D).astype(jnp.float32)

    if block_h >= D:
        # Resident-weight fast path: grid over batch tiles only.
        out = pl.pallas_call(
            _simple_kernel,
            out_shape=jax.ShapeDtypeStruct((B, D), x.dtype),
            grid_spec=pltpu.PrefetchScalarGridSpec(
                num_scalar_prefetch=0,
                grid=(grid_b,),
                in_specs=[
                    pl.BlockSpec((block_b, D), lambda i: (i, 0)),      # x tile
                    pl.BlockSpec((D, D), lambda i: (0, 0),
                                 pipeline_mode=pl.Buffered(1)),        # W1^T resident
                    pl.BlockSpec((1, D), lambda i: (0, 0)),            # b1
                    pl.BlockSpec((D, D), lambda i: (0, 0),
                                 pipeline_mode=pl.Buffered(1)),        # W2^T resident
                    pl.BlockSpec((1, D), lambda i: (0, 0)),            # b2
                ],
                out_specs=pl.BlockSpec((block_b, D), lambda i: (i, 0)),
            ),
            compiler_params=pltpu.CompilerParams(
                dimension_semantics=("parallel",),
                vmem_limit_bytes=vmem_limit_bytes,
            ),
        )(x, w1_bf, b1_f, w2_bf, b2_f)
    else:
        # Large-D path: tile the hidden dim, accumulate linear2 in VMEM scratch.
        grid_h = D // block_h
        out = pl.pallas_call(
            _hidden_tiled_kernel,
            out_shape=jax.ShapeDtypeStruct((B, D), x.dtype),
            grid_spec=pltpu.PrefetchScalarGridSpec(
                num_scalar_prefetch=0,
                grid=(grid_b, grid_h),
                in_specs=[
                    pl.BlockSpec((block_b, D), lambda i, h: (i, 0)),   # x resident over h
                    pl.BlockSpec((D, block_h), lambda i, h: (0, h)),   # W1^T column tile
                    pl.BlockSpec((1, block_h), lambda i, h: (0, h)),   # b1 tile
                    pl.BlockSpec((block_h, D), lambda i, h: (h, 0)),   # W2^T row tile
                    pl.BlockSpec((1, D), lambda i, h: (0, 0)),         # b2
                ],
                out_specs=pl.BlockSpec((block_b, D), lambda i, h: (i, 0)),
                scratch_shapes=[pltpu.VMEM((block_b, D), jnp.float32)],
            ),
            compiler_params=pltpu.CompilerParams(
                dimension_semantics=("parallel", "arbitrary"),
                vmem_limit_bytes=vmem_limit_bytes,
            ),
        )(x, w1_bf, b1_f, w2_bf, b2_f)
    return out


def residual_block(x, w1_t, b1, w2_t, b2, *, block_b=None, block_h=None,
                   vmem_limit_bytes=None):
    """x: (B, D) f32; w*_t: (D, D) pre-transposed weights (bf16 preferred);
    b*: (1, D) or (D,) f32."""
    B, D = x.shape
    budget = _vmem_budget_bytes()
    auto_b, auto_h = _choose_tiles(B, D, budget)
    block_b = auto_b if block_b is None else int(block_b)
    block_h = auto_h if block_h is None else int(block_h)
    if vmem_limit_bytes is None:
        vmem_limit_bytes = budget

    assert block_b % _SUBLANE == 0, "block_b must be a multiple of 8 (f32 sublane)"
    if block_h < D:
        assert D % block_h == 0 and block_h % _LANE == 0, (
            "hidden tile must be a 128-multiple divisor of D")
    # Perf note: D % 128 == 0 keeps outputs lane-dense; other D still works
    # (full-D blocks), just with masked partial stores.

    return _residual_block_call(x, w1_t, b1, w2_t, b2,
                                block_b=block_b, block_h=block_h,
                                vmem_limit_bytes=int(vmem_limit_bytes))


# ---------------------------------------------------------------------------
# Parameter prep + pure-JAX reference
# ---------------------------------------------------------------------------
def _init_linear_params(key, dim):
    """Mimic nn.Linear init: uniform(-1/sqrt(dim), 1/sqrt(dim)); weight stored
    pre-transposed (in, out) and cast ONCE to bf16."""
    kw, kb = jax.random.split(key)
    bound = 1.0 / jnp.sqrt(jnp.float32(dim))
    w_t = jax.random.uniform(kw, (dim, dim), jnp.float32, -bound, bound)
    b = jax.random.uniform(kb, (1, dim), jnp.float32, -bound, bound)
    return w_t.astype(jnp.bfloat16), b


def _reference(x, w1_bf, b1, w2_bf, b2):
    """Pure-JAX reference with the same bf16-matmul / f32-accumulate semantics."""
    h = jnp.dot(x.astype(jnp.bfloat16), w1_bf,
                preferred_element_type=jnp.float32) + b1
    h = jnp.maximum(h, 0.0)
    out = jnp.dot(h.astype(jnp.bfloat16), w2_bf,
                  preferred_element_type=jnp.float32) + b2 + x
    return jnp.maximum(out, 0.0)


# ---------------------------------------------------------------------------
# Demo / self-test
# ---------------------------------------------------------------------------
if __name__ == "__main__":
    key = jax.random.PRNGKey(0)
    k_x, k_l1, k_l2, k_x2, k_l3, k_l4 = jax.random.split(key, 6)

    # 1) Small shape on the resident-weight fast path (single batch tile).
    B, D = 16, 128
    x = jax.random.normal(k_x, (B, D), jnp.float32)
    w1_t, b1 = _init_linear_params(k_l1, D)
    w2_t, b2 = _init_linear_params(k_l2, D)

    out = jax.block_until_ready(residual_block(x, w1_t, b1, w2_t, b2))
    ref = _reference(x, w1_t, b1, w2_t, b2)
    assert out.shape == (B, D)
    assert jnp.allclose(out, ref, atol=5e-3, rtol=5e-3), (
        float(jnp.max(jnp.abs(out - ref))))

    # 2) Ragged batch (B=5): no wrapper pad — relies on masked edge blocks.
    x_odd = x[:5]
    out_odd = jax.block_until_ready(residual_block(x_odd, w1_t, b1, w2_t, b2))
    ref_odd = _reference(x_odd, w1_t, b1, w2_t, b2)
    assert out_odd.shape == (5, D)
    assert jnp.allclose(out_odd, ref_odd, atol=5e-3, rtol=5e-3)

    # 3) Exercise the hidden-tiled accumulator path (forced small tiles) with a
    #    ragged batch edge (24 rows over two 16-row tiles).
    B2, D2 = 24, 256
    x2 = jax.random.normal(k_x2, (B2, D2), jnp.float32)
    w3_t, b3 = _init_linear_params(k_l3, D2)
    w4_t, b4 = _init_linear_params(k_l4, D2)
    out2 = jax.block_until_ready(
        residual_block(x2, w3_t, b3, w4_t, b4, block_b=16, block_h=128))
    ref2 = _reference(x2, w3_t, b3, w4_t, b4)
    assert out2.shape == (B2, D2)
    assert jnp.allclose(out2, ref2, atol=5e-3, rtol=5e-3), (
        float(jnp.max(jnp.abs(out2 - ref2))))

    print("KERNEL_OK")
</pallas_src>

<mosaic_0001>
module attributes {stable_mosaic.version = 11 : i64} {
  func.func @_simple_kernel(%arg0: i32, %arg1: memref<16x128xf32, #tpu.memory_space<vmem>>, %arg2: memref<128x128xbf16, #tpu.memory_space<vmem>>, %arg3: memref<1x128xf32, #tpu.memory_space<vmem>>, %arg4: memref<128x128xbf16, #tpu.memory_space<vmem>>, %arg5: memref<1x128xf32, #tpu.memory_space<vmem>>, %arg6: memref<16x128xf32, #tpu.memory_space<vmem>>) attributes {dimension_semantics = [#tpu.dimension_semantics<parallel>], iteration_bounds = array<i64: 1>, scalar_prefetch = 0 : i64, scratch_operands = 0 : i64, tpu.core_type = #tpu.core_type<tc>, window_params = [{transform_indices = @transform_0, window_bounds = array<i64: 16, 128>}, {pipeline_mode = #tpu.pipeline_mode<synchronous>, transform_indices = @transform_1, window_bounds = array<i64: 128, 128>}, {pipeline_mode = #tpu.pipeline_mode<synchronous>, transform_indices = @transform_2, window_bounds = array<i64: 1, 128>}, {pipeline_mode = #tpu.pipeline_mode<synchronous>, transform_indices = @transform_3, window_bounds = array<i64: 128, 128>}, {pipeline_mode = #tpu.pipeline_mode<synchronous>, transform_indices = @transform_4, window_bounds = array<i64: 1, 128>}, {transform_indices = @transform_5, window_bounds = array<i64: 16, 128>}]} {
    %c0 = arith.constant 0 : index
    %c0_0 = arith.constant 0 : index
    %0 = vector.load %arg1[%c0, %c0_0] : memref<16x128xf32, #tpu.memory_space<vmem>>, vector<16x128xf32>
    %1 = arith.truncf %0 : vector<16x128xf32> to vector<16x128xbf16>
    %c0_1 = arith.constant 0 : index
    %c0_2 = arith.constant 0 : index
    %2 = vector.load %arg2[%c0_1, %c0_2] : memref<128x128xbf16, #tpu.memory_space<vmem>>, vector<128x128xbf16>
    %cst = arith.constant dense<0.000000e+00> : vector<16x128xf32>
    %3 = tpu.matmul %1, %2, %cst {dimension_numbers = #tpu.dot_dimension_numbers<[1], [0], [0], [1], [0, 0, 1, 1], [], []>} : vector<16x128xbf16>, vector<128x128xbf16>, vector<16x128xf32> -> vector<16x128xf32>
    %c0_3 = arith.constant 0 : index
    %c0_4 = arith.constant 0 : index
    %4 = vector.load %arg3[%c0_3, %c0_4] : memref<1x128xf32, #tpu.memory_space<vmem>>, vector<1x128xf32>
    %5 = vector.broadcast %4 : vector<1x128xf32> to vector<16x128xf32>
    %6 = arith.addf %3, %5 : vector<16x128xf32>
    %cst_5 = arith.constant 0.000000e+00 : f32
    %7 = vector.broadcast %cst_5 : f32 to vector<16x128xf32>
    %8 = arith.maximumf %6, %7 : vector<16x128xf32>
    %9 = arith.truncf %8 : vector<16x128xf32> to vector<16x128xbf16>
    %c0_6 = arith.constant 0 : index
    %c0_7 = arith.constant 0 : index
    %10 = vector.load %arg4[%c0_6, %c0_7] : memref<128x128xbf16, #tpu.memory_space<vmem>>, vector<128x128xbf16>
    %cst_8 = arith.constant dense<0.000000e+00> : vector<16x128xf32>
    %11 = tpu.matmul %9, %10, %cst_8 {dimension_numbers = #tpu.dot_dimension_numbers<[1], [0], [0], [1], [0, 0, 1, 1], [], []>} : vector<16x128xbf16>, vector<128x128xbf16>, vector<16x128xf32> -> vector<16x128xf32>
    %c0_9 = arith.constant 0 : index
    %c0_10 = arith.constant 0 : index
    %12 = vector.load %arg5[%c0_9, %c0_10] : memref<1x128xf32, #tpu.memory_space<vmem>>, vector<1x128xf32>
    %13 = vector.broadcast %12 : vector<1x128xf32> to vector<16x128xf32>
    %14 = arith.addf %11, %13 : vector<16x128xf32>
    %15 = arith.addf %14, %0 : vector<16x128xf32>
    %cst_11 = arith.constant 0.000000e+00 : f32
    %16 = vector.broadcast %cst_11 : f32 to vector<16x128xf32>
    %17 = arith.maximumf %15, %16 : vector<16x128xf32>
    %c0_12 = arith.constant 0 : index
    %c0_13 = arith.constant 0 : index
    %18 = vector.load %arg6[%c0_12, %c0_13] : memref<16x128xf32, #tpu.memory_space<vmem>>, vector<16x128xf32>
    tpu.vector_store %arg6[%c0_12, %c0_13], %17 {strides = array<i32>} : memref<16x128xf32, #tpu.memory_space<vmem>>, vector<16x128xf32>,
    return
  }
  func.func @transform_0(%arg0: i32) -> (i32, i32) {
    %c0_i32 = arith.constant 0 : i32
    %c0_i32_0 = arith.constant 0 : i32
    return %arg0, %c0_i32 : i32, i32
  }
  func.func @transform_1(%arg0: i32) -> (i32, i32) {
    %c0_i32 = arith.constant 0 : i32
    %c0_i32_0 = arith.constant 0 : i32
    %c0_i32_1 = arith.constant 0 : i32
    return %c0_i32, %c0_i32_0 : i32, i32
  }
  func.func @transform_2(%arg0: i32) -> (i32, i32) {
    %c0_i32 = arith.constant 0 : i32
    %c0_i32_0 = arith.constant 0 : i32
    %c0_i32_1 = arith.constant 0 : i32
    return %c0_i32, %c0_i32_0 : i32, i32
  }
  func.func @transform_3(%arg0: i32) -> (i32, i32) {
    %c0_i32 = arith.constant 0 : i32
    %c0_i32_0 = arith.constant 0 : i32
    %c0_i32_1 = arith.constant 0 : i32
    return %c0_i32, %c0_i32_0 : i32, i32
  }
  func.func @transform_4(%arg0: i32) -> (i32, i32) {
    %c0_i32 = arith.constant 0 : i32
    %c0_i32_0 = arith.constant 0 : i32
    %c0_i32_1 = arith.constant 0 : i32
    return %c0_i32, %c0_i32_0 : i32, i32
  }
  func.func @transform_5(%arg0: i32) -> (i32, i32) {
    %c0_i32 = arith.constant 0 : i32
    %c0_i32_0 = arith.constant 0 : i32
    return %arg0, %c0_i32 : i32, i32
  }
}

</mosaic_0001>

<bundles_post_ra>
// kernel: _residual_block_call.1
= control target key start
LH: loop header
LB: loop body
LE: loop exit
PB: predicated region body
PF: predicated region fallthrough
CT: control target
= control target key end

     0   :  { %10 = vsyncpa [#allocation3], 0  ;;  %s619_s0 = inlined_call_operand.hbm [shape: f32[16,128], index: 0, kind: input, shape index: {}]   ;;  %s620_s1 = inlined_call_operand.hbm [shape: bf16[128,128], index: 1, kind: input, shape index: {}]   ;;  %s621_s2 = inlined_call_operand.vmem [shape: f32[1,128], index: 2, kind: input, shape index: {}]   ;;  %s622_s3 = inlined_call_operand.hbm [shape: bf16[128,128], index: 3, kind: input, shape index: {}]   ;;  %s623_s4 = inlined_call_operand.vmem [shape: f32[1,128], index: 4, kind: input, shape index: {}]   ;;  %s624_s5 = inlined_call_operand.hbm [shape: f32[16,128], index: 5, kind: output, shape index: {}]  }
   0x1   :  { %11 = vsyncpa [#allocation6], 0 }
   0x2   :  { %12 = vsyncpa [#allocation4], 0  ;;  %s513_s18 = smov [#allocation5]   ;;  %s419_s22 = scalar_lea.hbm %s620_s1, 1024 }
   0x3   :  { %s30_s19 = sshll.u32 %s513_s18, 4  ;;  %p420_p0 = scmp.ne.s32.totalorder %s620_s1, %s419_s22  ;;  %s31_s19 = int_to_ptr.vmem [resolvable:$true] %s30_s19 }
   0x4   :  { %p423_p1 = scmp.lt.u32.totalorder %s419_s22, %s620_s1 }
   0x6   :  { %p425_p2 = pnand %p423_p1, %p420_p0 }
   0x8   :  { %428 = shalt.err (!%p425_p2)
}
   0x9   :  { %s429_s27 = scalar_lea.vmem %s31_s19, 1024  ;;  %p434_p4 = scmp.lt.s32.totalorder %s31_s19, %s31_s19 }
   0xa   :  { %p430_p3 = scmp.ne.s32.totalorder %s31_s19, %s429_s27  ;;  %p435_p5 = scmp.lt.s32.totalorder %s429_s27, %s429_s27 }
   0xc   :  { %p436_p6 = por %p435_p5, %p434_p4 }
   0xe   :  { %p437_p7 = pnand %p436_p6, %p430_p3 }
  0x10   :  { %440 = shalt.err (!%p437_p7)
}
  0x11   :  { %s514_s28 = smov 64   ;;  %s515_s29 = smov 4  }
  0x12   :  { %36 = dma.hbm_to_vmem [thread:$0]  %s620_s1, 1024, %s31_s19, [#allocation6], %s514_s28, %s514_s28, %s515_s29  }
  0x13   :  { %s516_s7 = smov [#allocation2]   ;;  %s441_s11 = scalar_lea.hbm %s619_s0, 256 }
  0x14   :  { %s18_s8 = sshll.u32 %s516_s7, 4  ;;  %p442_p8 = scmp.ne.s32.totalorder %s619_s0, %s441_s11  ;;  %s19_s8 = int_to_ptr.vmem [resolvable:$true] %s18_s8 }
  0x15   :  { %p445_p9 = scmp.lt.u32.totalorder %s441_s11, %s619_s0 }
  0x17   :  { %p447_p10 = pnand %p445_p9, %p442_p8 }
  0x19   :  { %450 = shalt.err (!%p447_p10)
}
  0x1a   :  { %s451_s16 = scalar_lea.vmem %s19_s8, 256  ;;  %p456_p12 = scmp.lt.s32.totalorder %s19_s8, %s19_s8 }
  0x1b   :  { %p452_p11 = scmp.ne.s32.totalorder %s19_s8, %s451_s16  ;;  %p457_p13 = scmp.lt.s32.totalorder %s451_s16, %s451_s16 }
  0x1d   :  { %p458_p0 = por %p457_p13, %p456_p12 }
  0x1f   :  { %p459_p1 = pnand %p458_p0, %p452_p11 }
  0x21   :  { %462 = shalt.err (!%p459_p1)
}
  0x22   :  { %s517_s1 = smov 128   ;;  %s518_s17 = smov 8  }
  0x23   :  { %24 = dma.hbm_to_vmem [thread:$0]  %s619_s0, 256, %s19_s8, [#allocation3], %s517_s1, %s517_s1, %s518_s17  }
  0x24   :  { %s519_s20 = smov [#allocation7]   ;;  %s463_s24 = scalar_lea.hbm %s622_s3, 1024 }
  0x25   :  { %s44_s21 = sshll.u32 %s519_s20, 4  ;;  %p464_p2 = scmp.ne.s32.totalorder %s622_s3, %s463_s24  ;;  %s45_s21 = int_to_ptr.vmem [resolvable:$true] %s44_s21 }
  0x26   :  { %p467_p3 = scmp.lt.u32.totalorder %s463_s24, %s622_s3 }
  0x28   :  { %p469_p4 = pnand %p467_p3, %p464_p2 }
  0x2a   :  { %472 = shalt.err (!%p469_p4)
}
  0x2b   :  { %s473_s6 = scalar_lea.vmem %s45_s21, 1024  ;;  %p478_p6 = scmp.lt.s32.totalorder %s45_s21, %s45_s21 }
  0x2c   :  { %p474_p5 = scmp.ne.s32.totalorder %s45_s21, %s473_s6  ;;  %p479_p7 = scmp.lt.s32.totalorder %s473_s6, %s473_s6 }
  0x2e   :  { %p480_p8 = por %p479_p7, %p478_p6 }
  0x30   :  { %p481_p9 = pnand %p480_p8, %p474_p5 }
  0x32   :  { %484 = shalt.err (!%p481_p9)
}
  0x33   :  { %50 = dma.hbm_to_vmem [thread:$0]  %s622_s3, 1024, %s45_s21, [#allocation6], %s514_s28, %s514_s28, %s515_s29  }
  0x34   :  { %507 = dma.done.wait [#allocation3], 256  }
  0x35   :  { %508 = vsyncadd [#allocation3], 4294967040 }
  0x36   :  { %509 = dma.done.wait [#allocation6], 2048  }
  0x37   :  { %510 = vsyncadd [#allocation6], 4294965248  ;;  %v520_v0 = vmov 0.0   ;;  %vm521_vm0 = vmmov 0   ;;  %v403_v1 = vld [vmem:[#allocation5] sm:$0xff]   ;;  %v404_v2 = vld [vmem:[#allocation5 + $0x8] sm:$0xff]  }
  0x38   :  { %353 = vmatprep.subr.bf16.mxu0 %v520_v0  ;;  %369 = vmatprep.mubr.msk.bf16.mxu0 %vm521_vm0, %v520_v0  ;;  %v405_v3 = vld [vmem:[#allocation5 + $0x10] sm:$0xff]   ;;  %v411_v4 = vld [vmem:[#allocation7] sm:$0xff]   ;;  %v406_v5 = vld [vmem:[#allocation5 + $0x18] sm:$0xff]  }
  0x39   :  { %373 = vmatprep.subr.bf16.mxu1 %v520_v0  ;;  %389 = vmatprep.mubr.msk.bf16.mxu1 %vm521_vm0, %v520_v0  ;;  %v412_v6 = vld [vmem:[#allocation7 + $0x8] sm:$0xff]   ;;  %v407_v7 = vld [vmem:[#allocation5 + $0x20] sm:$0xff]   ;;  %v413_v8 = vld [vmem:[#allocation7 + $0x10] sm:$0xff]  }
  0x3a   :  { %354 = vmatpush3.bf16.msra.mxu0 %v403_v1  ;;  %374 = vmatpush3.bf16.msra.mxu1 %v411_v4  ;;  %v408_v9 = vld [vmem:[#allocation5 + $0x28] sm:$0xff]   ;;  %v414_v10 = vld [vmem:[#allocation7 + $0x18] sm:$0xff]   ;;  %v409_v11 = vld [vmem:[#allocation5 + $0x30] sm:$0xff]  }
  0x3b   :  { %355 = vmatprep.subr.bf16.mxu0 %v520_v0  ;;  %375 = vmatprep.subr.bf16.mxu1 %v520_v0  ;;  %v415_v12 = vld [vmem:[#allocation7 + $0x20] sm:$0xff]   ;;  %v410_v13 = vld [vmem:[#allocation5 + $0x38] sm:$0xff]   ;;  %v63_v14 = vld [vmem:[#allocation2] sm:$0xff] }
  0x3c   :  { %v64_v15 = vld [vmem:[#allocation2 + $0x8] sm:$0xff]  ;;  %v416_v16 = vld [vmem:[#allocation7 + $0x28] sm:$0xff]   ;;  %v417_v18 = vld [vmem:[#allocation7 + $0x30] sm:$0xff]  }
  0x3d   :  { %v65_v17 = vpack.c.bf16 %v64_v15, %v63_v14  ;;  %v418_v19 = vld [vmem:[#allocation7 + $0x38] sm:$0xff]   ;;  %v317_v20 = vld [vmem:[%s621_s2] ss:$0 sm:$0xff]  ;;  %s522_s2 = smov [#allocation8]  }
  0x3e   :  { %356 = vmatpush3.bf16.msra.mxu0 %v404_v2  ;;  %376 = vmatpush3.bf16.msra.mxu1 %v412_v6  ;;  %v326_v30 = vld [vmem:[%s623_s4] ss:$0 sm:$0xff]  ;;  %s304_s9 = sshll.u32 %s522_s2, 4  ;;  %s305_s9 = int_to_ptr.vmem [resolvable:$true] %s304_s9 }
  0x3f   :  { %357 = vmatprep.subr.bf16.mxu0 %v520_v0  ;;  %377 = vmatprep.subr.bf16.mxu1 %v520_v0  ;;  %s485_s10 = scalar_lea.vmem %s305_s9, 256  ;;  %p490_p11 = scmp.lt.s32.totalorder %s305_s9, %s305_s9 }
  0x40   :  { %p486_p10 = scmp.ne.s32.totalorder %s305_s9, %s485_s10  ;;  %p491_p12 = scmp.lt.s32.totalorder %s485_s10, %s485_s10 }
  0x42   :  { %358 = vmatpush3.bf16.msra.mxu0 %v405_v3  ;;  %378 = vmatpush3.bf16.msra.mxu1 %v413_v8  ;;  %p492_p13 = por %p491_p12, %p490_p11 }
  0x43   :  { %359 = vmatprep.subr.bf16.mxu0 %v520_v0  ;;  %379 = vmatprep.subr.bf16.mxu1 %v520_v0 }
  0x44   :  { %p493_p0 = pnand %p492_p13, %p486_p10 }
  0x46   :  { %360 = vmatpush3.bf16.msra.mxu0 %v406_v5  ;;  %380 = vmatpush3.bf16.msra.mxu1 %v414_v10 }
  0x47   :  { %361 = vmatprep.subr.bf16.mxu0 %v520_v0  ;;  %381 = vmatprep.subr.bf16.mxu1 %v520_v0 }
  0x4a   :  { %362 = vmatpush3.bf16.msra.mxu0 %v407_v7  ;;  %382 = vmatpush3.bf16.msra.mxu1 %v415_v12 }
  0x4b   :  { %363 = vmatprep.subr.bf16.mxu0 %v520_v0  ;;  %383 = vmatprep.subr.bf16.mxu1 %v520_v0 }
  0x4e   :  { %364 = vmatpush3.bf16.msra.mxu0 %v408_v9  ;;  %384 = vmatpush3.bf16.msra.mxu1 %v416_v16 }
  0x4f   :  { %365 = vmatprep.subr.bf16.mxu0 %v520_v0  ;;  %385 = vmatprep.subr.bf16.mxu1 %v520_v0 }
  0x52   :  { %366 = vmatpush3.bf16.msra.mxu0 %v409_v11  ;;  %386 = vmatpush3.bf16.msra.mxu1 %v417_v18 }
  0x53   :  { %367 = vmatprep.subr.bf16.mxu0 %v520_v0  ;;  %387 = vmatprep.subr.bf16.mxu1 %v520_v0 }
  0x56   :  { %368 = vmatpush3.bf16.msra.mxu0 %v410_v13  ;;  %388 = vmatpush3.bf16.msra.mxu1 %v418_v19 }
  0x59   :  { %370 = vmatmul.mubr.bf16.vlgmr.msra.gmra.mrb[0].mxu0 %v65_v17 }
 0x12c   :  { %v171_v21 = vpop.f32.mrb[0].mxu0 }
 0x12d   :  { %v172_v22 = vadd.f32 %v317_v20, %v171_v21  ;;  %v371_v23 = vpop.f32.mrb[1].mxu0 }
 0x12e   :  { %v174_v24 = vpop.f32.mrb[2].mxu0 }
 0x12f   :  { %v175_v25 = vadd.f32 %v317_v20, %v174_v24  ;;  %v372_v26 = vpop.f32.mrb[3].mxu0  ;;  %v178_v27 = vmax.f32 %v172_v22, 0.0 }
 0x131   :  { %v179_v28 = vmax.f32 %v175_v25, 0.0 }
 0x133   :  { %v180_v29 = vpack.c.bf16 %v179_v28, %v178_v27 }
 0x135   :  { %390 = vmatmul.mubr.bf16.vlgmr.msra.gmra.mrb[0].mxu1 %v180_v29 }
 0x208   :  { %v286_v31 = vpop.f32.mrb[0].mxu1 }
 0x209   :  { %v287_v32 = vadd.f32 %v326_v30, %v286_v31  ;;  %v391_v33 = vpop.f32.mrb[1].mxu1 }
 0x20a   :  { %v289_v34 = vpop.f32.mrb[2].mxu1 }
 0x20b   :  { %v293_v35 = vadd.f32 %v287_v32, %v63_v14  ;;  %v290_v36 = vadd.f32 %v326_v30, %v289_v34  ;;  %v392_v37 = vpop.f32.mrb[3].mxu1 }
 0x20d   :  { %v295_v38 = vmax.f32 %v293_v35, 0.0  ;;  %v294_v39 = vadd.f32 %v290_v36, %v64_v15 }
 0x20f   :  { %297 = vst [vmem:[#allocation8] sm:$0xff] %v295_v38  ;;  %v296_v40 = vmax.f32 %v294_v39, 0.0 }
 0x211   :  { %298 = vst [vmem:[#allocation8 + $0x8] sm:$0xff] %v296_v40 }
 0x212   :  { %496 = shalt.err (!%p493_p0)
}
 0x213   :  { %s497_s12 = scalar_lea.hbm %s624_s5, 256 }
 0x214   :  { %p498_p1 = scmp.ne.s32.totalorder %s624_s5, %s497_s12  ;;  %p501_p2 = scmp.lt.u32.totalorder %s497_s12, %s624_s5 }
 0x216   :  { %p503_p3 = pnand %p501_p2, %p498_p1 }
 0x218   :  { %506 = shalt.err (!%p503_p3)
}
 0x219   :  { %310 = dma.vmem_to_hbm [thread:$0]  %s305_s9, 256, %s624_s5, [#allocation4], %s517_s1, %s517_s1, %s518_s17  }
 0x21a   :  { %511 = dma.done.wait [#allocation4], 256  }
 0x21b   :  { %512 = vsyncadd [#allocation4], 4294967040 }
 0x21c   :  { %314 = vsyncpa [#allocation3], 1 }
 0x21d   :  { %315 = vsyncpa [#allocation6], 1 }
 0x21e   :  { %316 = vsyncpa [#allocation4], 1 }

</bundles_post_ra>
